<compile_context>
chip_gen: v5e
topology: v5e:2x2
jax: 0.10.0
libtpu: 0.0.40
codegen_flags: <defaults>
</compile_context>

<pallas_src>
import numpy as np

import jax
import jax.numpy as jnp
from jax.experimental import pallas as pl
from jax.experimental.pallas import tpu as pltpu


# --------------------------------------------------------------------------
# Kernel
# --------------------------------------------------------------------------
def _spectral_conv1d_kernel(x_ref, fwd_ref, inv_ref, wa_ref, wb_ref, o_ref):
    """One tile of TM rows (rows = flattened batch*heads).

    x_ref  : (E, TM, N)   real input, channel-major
    fwd_ref: (N, 2K)      fused forward rDFT basis    [cos | -sin]
    inv_ref: (2K, N)      truncated inverse basis     [c_k cos ; -c_k sin] / N
    wa_ref : (E, O, 2K)   lane-paired mixing weights  [wr | wr]
    wb_ref : (E, O, 2K)   lane-paired mixing weights  [-wi | wi]
    o_ref  : (O, TM, N)   real output, channel-major
    """
    E, TM, N = x_ref.shape
    O = wa_ref.shape[1]
    K = wa_ref.shape[2] // 2
    f32 = jnp.float32

    fwd = fwd_ref[...]            # (N, 2K)
    inv = inv_ref[...]            # (2K, N)
    wa = wa_ref[...]              # (E, O, 2K)
    wb = wb_ref[...]              # (E, O, 2K)

    # (1) Forward truncated rDFT of every input channel with ONE MXU matmul.
    #     (E, TM) -> (E*TM) is a sublane-aligned merge (TM % 8 == 0): free.
    ft_all = jnp.dot(x_ref[...].reshape(E * TM, N), fwd,
                     preferred_element_type=f32)           # (E*TM, 2K) = [Re | Im]

    # Per-channel spectra + lane-swapped copies [Im | Re], hoisted out of the
    # output-channel loop (static sublane slices are free).
    ft = [ft_all[e * TM:(e + 1) * TM, :] for e in range(E)]
    ft_sw = [jnp.concatenate([f[:, K:], f[:, :K]], axis=-1) for f in ft]

    # (2) Complex channel mixing on the VPU at full 2K lane width:
    #       [Re|Im]*[wr|wr] + [Im|Re]*[-wi|wi] = [Re*wr-Im*wi | Re*wi+Im*wr]
    # (3) Truncated inverse real DFT back to the time domain on the MXU,
    #     one lane-dense matmul + store per output channel.
    for o in range(O):
        acc = ft[0] * wa[0, o:o + 1, :] + ft_sw[0] * wb[0, o:o + 1, :]
        for e in range(1, E):
            acc = acc + ft[e] * wa[e, o:o + 1, :] + ft_sw[e] * wb[e, o:o + 1, :]
        o_ref[o] = jnp.dot(acc, inv,
                           preferred_element_type=f32).astype(o_ref.dtype)


# --------------------------------------------------------------------------
# Wrapper
# --------------------------------------------------------------------------
_BASIS_CACHE = {}


def _dft_bases(N, K):
    """Host-side (cached) truncated rDFT / inverse-rDFT bases."""
    key = (N, K)
    if key not in _BASIS_CACHE:
        n = np.arange(N, dtype=np.float64)
        k = np.arange(K, dtype=np.float64)
        ang = 2.0 * np.pi * np.outer(k, n) / float(N)                # (K, N)
        cos = np.cos(ang)
        sin = np.sin(ang)
        fwd = np.concatenate([cos, -sin], axis=0).T                  # (N, 2K)
        ck = np.where(k == 0, 1.0, 2.0)[:, None]                     # DC weight 1, rest 2
        inv = np.concatenate([ck * cos, -(ck * sin)], axis=0) / float(N)  # (2K, N)
        _BASIS_CACHE[key] = (jnp.asarray(fwd, dtype=jnp.float32),
                             jnp.asarray(inv, dtype=jnp.float32))
    return _BASIS_CACHE[key]


def _pick_block_m(M, E, O, N, K):
    """Largest row tile whose double-buffered I/O + spectra fit ~8 MiB."""
    lane_n = -(-N // 128) * 128
    lane_2k = -(-(2 * K) // 128) * 128
    io_per_row = (E + O) * lane_n * 4 * 2          # f32, double-buffered in + out
    spec_per_row = 2 * E * lane_2k * 4             # ft + lane-swapped copy (spill)
    per_row = io_per_row + spec_per_row
    tm = 512
    while tm > 8 and tm * per_row > (8 << 20):
        tm //= 2
    return min(tm, max(8, M))


def spectral_conv1d_pallas(x, weights_real, weights_imag, *, block_m=None):
    """x: (B, H, in_channels, N); weights_*: (in_channels, out_channels, modes)."""
    B, H, E, N = x.shape
    Ew, O, K = weights_real.shape
    assert Ew == E and K <= N // 2
    M = B * H

    fwd, inv = _dft_bases(N, K)
    wr = weights_real.astype(jnp.float32)
    wi = weights_imag.astype(jnp.float32)
    wa = jnp.concatenate([wr, wr], axis=-1)        # (E, O, 2K)  [wr | wr]
    wb = jnp.concatenate([-wi, wi], axis=-1)       # (E, O, 2K)  [-wi | wi]

    # Channel-major layout: (E, M, N) so the kernel slices channels on the
    # (free) leading axis and every matmul / store stays lane-dense in N.
    x_cm = jnp.transpose(x, (2, 0, 1, 3)).reshape(E, M, N).astype(jnp.float32)

    if block_m is None:
        block_m = _pick_block_m(M, E, O, N, K)
    tm = max(8, (min(block_m, 512) // 8) * 8)      # sublane-aligned row tile
    m_pad = ((M + tm - 1) // tm) * tm
    if m_pad != M:
        x_cm = jnp.pad(x_cm, ((0, 0), (0, m_pad - M), (0, 0)))
    grid_m = m_pad // tm

    # Advisory cost + explicit VMEM budget.
    flops = (2 * M * E * N * 2 * K          # forward DFT (MXU)
             + 4 * M * E * O * 2 * K        # complex mixing (VPU)
             + 2 * M * O * 2 * K * N)       # inverse DFT (MXU)
    bytes_accessed = 4 * (M * E * N + M * O * N
                          + 2 * (N * 2 * K) + 2 * (E * O * 2 * K))
    cost = pl.CostEstimate(flops=flops, transcendentals=0,
                           bytes_accessed=bytes_accessed)

    lane_n = -(-N // 128) * 128
    lane_2k = -(-(2 * K) // 128) * 128
    tile_bytes = 4 * tm * ((E + O) * lane_n * 2 + 2 * E * lane_2k)
    vmem_limit = int(min(max(tile_bytes + (8 << 20), 16 << 20), 32 << 20))

    out_cm = pl.pallas_call(
        _spectral_conv1d_kernel,
        out_shape=jax.ShapeDtypeStruct((O, m_pad, N), jnp.float32),
        grid=(grid_m,),
        in_specs=[
            pl.BlockSpec((E, tm, N), lambda i: (0, i, 0)),        # x tile
            pl.BlockSpec((N, 2 * K), lambda i: (0, 0)),           # fwd basis (resident)
            pl.BlockSpec((2 * K, N), lambda i: (0, 0)),           # inv basis (resident)
            pl.BlockSpec((E, O, 2 * K), lambda i: (0, 0, 0)),     # paired weights
            pl.BlockSpec((E, O, 2 * K), lambda i: (0, 0, 0)),
        ],
        out_specs=pl.BlockSpec((O, tm, N), lambda i: (0, i, 0)),
        compiler_params=pltpu.CompilerParams(
            dimension_semantics=("parallel",),
            vmem_limit_bytes=vmem_limit),
        cost_estimate=cost,
    )(x_cm, fwd, inv, wa, wb)

    out = out_cm[:, :M, :].reshape(O, B, H, N)
    return jnp.transpose(out, (1, 2, 0, 3))


# --------------------------------------------------------------------------
# Pure-JAX reference (mirrors the PyTorch forward, uses jnp.fft)
# --------------------------------------------------------------------------
def spectral_conv1d_reference(x, weights_real, weights_imag, modes):
    B, H, E, N = x.shape
    O = weights_real.shape[1]
    x_ft = jnp.fft.rfft(x, axis=-1)
    a = x_ft[..., :modes]
    out_r = (jnp.einsum('bjix,iox->bjox', a.real, weights_real)
             - jnp.einsum('bjix,iox->bjox', a.imag, weights_imag))
    out_i = (jnp.einsum('bjix,iox->bjox', a.real, weights_imag)
             + jnp.einsum('bjix,iox->bjox', a.imag, weights_real))
    out_ft = jnp.zeros((B, H, O, N // 2 + 1), dtype=jnp.complex64)
    out_ft = out_ft.at[..., :modes].set(out_r + 1j * out_i)
    return jnp.fft.irfft(out_ft, n=N, axis=-1)


# --------------------------------------------------------------------------
# Demo / self-check
# --------------------------------------------------------------------------
if __name__ == "__main__":
    def run_case(B, H, in_channels, out_channels, seq_len, block_m):
        modes = min(32, seq_len // 2)
        key = jax.random.PRNGKey(0)
        k1, k2, k3 = jax.random.split(key, 3)
        scale = 1.0 / (in_channels * out_channels)
        weights_real = scale * jax.random.uniform(
            k1, (in_channels, out_channels, modes), dtype=jnp.float32)
        weights_imag = scale * jax.random.uniform(
            k2, (in_channels, out_channels, modes), dtype=jnp.float32)
        x = jax.random.normal(k3, (B, H, in_channels, seq_len), dtype=jnp.float32)

        out = spectral_conv1d_pallas(x, weights_real, weights_imag,
                                     block_m=block_m)
        out = jax.block_until_ready(out)

        ref = spectral_conv1d_reference(x, weights_real, weights_imag, modes)
        assert out.shape == ref.shape == (B, H, out_channels, seq_len)
        err = float(jnp.max(jnp.abs(out - ref)))
        assert err < 1e-3, f"mismatch vs FFT reference: max abs err = {err}"

    # M = 32, block_m = 8 -> grid=(4,): exercises the pipelined multi-tile path.
    run_case(B=4, H=8, in_channels=4, out_channels=4, seq_len=16, block_m=8)
    # M = 12, block_m = 8 -> padded to 16, grid=(2,): exercises the padding path.
    run_case(B=3, H=4, in_channels=4, out_channels=4, seq_len=16, block_m=8)
    # M = 4, auto block_m, uneven channel counts: exercises the default-tile path.
    run_case(B=2, H=2, in_channels=3, out_channels=5, seq_len=32, block_m=None)

    print("KERNEL_OK")
</pallas_src>

<mosaic_0001>
module attributes {stable_mosaic.version = 11 : i64} {
  func.func @_spectral_conv1d_kernel(%arg0: i32, %arg1: memref<4x8x16xf32, #tpu.memory_space<vmem>>, %arg2: memref<16x16xf32, #tpu.memory_space<vmem>>, %arg3: memref<16x16xf32, #tpu.memory_space<vmem>>, %arg4: memref<4x4x16xf32, #tpu.memory_space<vmem>>, %arg5: memref<4x4x16xf32, #tpu.memory_space<vmem>>, %arg6: memref<4x8x16xf32, #tpu.memory_space<vmem>>) attributes {dimension_semantics = [#tpu.dimension_semantics<parallel>], iteration_bounds = array<i64: 4>, scalar_prefetch = 0 : i64, scratch_operands = 0 : i64, tpu.core_type = #tpu.core_type<tc>, window_params = [{transform_indices = @transform_0, window_bounds = array<i64: 4, 8, 16>}, {pipeline_mode = #tpu.pipeline_mode<synchronous>, transform_indices = @transform_1, window_bounds = array<i64: 16, 16>}, {pipeline_mode = #tpu.pipeline_mode<synchronous>, transform_indices = @transform_2, window_bounds = array<i64: 16, 16>}, {pipeline_mode = #tpu.pipeline_mode<synchronous>, transform_indices = @transform_3, window_bounds = array<i64: 4, 4, 16>}, {pipeline_mode = #tpu.pipeline_mode<synchronous>, transform_indices = @transform_4, window_bounds = array<i64: 4, 4, 16>}, {transform_indices = @transform_5, window_bounds = array<i64: 4, 8, 16>}]} {
    %c0 = arith.constant 0 : index
    %c0_0 = arith.constant 0 : index
    %0 = vector.load %arg2[%c0, %c0_0] : memref<16x16xf32, #tpu.memory_space<vmem>>, vector<16x16xf32>
    %c0_1 = arith.constant 0 : index
    %c0_2 = arith.constant 0 : index
    %1 = vector.load %arg3[%c0_1, %c0_2] : memref<16x16xf32, #tpu.memory_space<vmem>>, vector<16x16xf32>
    %c0_3 = arith.constant 0 : index
    %c0_4 = arith.constant 0 : index
    %c0_5 = arith.constant 0 : index
    %2 = vector.load %arg4[%c0_3, %c0_4, %c0_5] : memref<4x4x16xf32, #tpu.memory_space<vmem>>, vector<4x4x16xf32>
    %c0_6 = arith.constant 0 : index
    %c0_7 = arith.constant 0 : index
    %c0_8 = arith.constant 0 : index
    %3 = vector.load %arg5[%c0_6, %c0_7, %c0_8] : memref<4x4x16xf32, #tpu.memory_space<vmem>>, vector<4x4x16xf32>
    %c0_9 = arith.constant 0 : index
    %c0_10 = arith.constant 0 : index
    %c0_11 = arith.constant 0 : index
    %4 = vector.load %arg1[%c0_9, %c0_10, %c0_11] : memref<4x8x16xf32, #tpu.memory_space<vmem>>, vector<4x8x16xf32>
    %5 = vector.shape_cast %4 : vector<4x8x16xf32> to vector<32x16xf32>
    %cst = arith.constant dense<0.000000e+00> : vector<32x16xf32>
    %6 = tpu.matmul %5, %0, %cst {dimension_numbers = #tpu.dot_dimension_numbers<[1], [0], [0], [1], [0, 0, 1, 1], [], []>} : vector<32x16xf32>, vector<16x16xf32>, vector<32x16xf32> -> vector<32x16xf32>
    %7 = vector.extract_strided_slice %6 {offsets = [0, 0], sizes = [8, 16], strides = [1, 1]} : vector<32x16xf32> to vector<8x16xf32>
    %8 = vector.extract_strided_slice %6 {offsets = [8, 0], sizes = [8, 16], strides = [1, 1]} : vector<32x16xf32> to vector<8x16xf32>
    %9 = vector.extract_strided_slice %6 {offsets = [16, 0], sizes = [8, 16], strides = [1, 1]} : vector<32x16xf32> to vector<8x16xf32>
    %10 = vector.extract_strided_slice %6 {offsets = [24, 0], sizes = [8, 16], strides = [1, 1]} : vector<32x16xf32> to vector<8x16xf32>
    %11 = vector.extract_strided_slice %7 {offsets = [0, 8], sizes = [8, 8], strides = [1, 1]} : vector<8x16xf32> to vector<8x8xf32>
    %12 = vector.extract_strided_slice %7 {offsets = [0, 0], sizes = [8, 8], strides = [1, 1]} : vector<8x16xf32> to vector<8x8xf32>
    %13 = tpu.concatenate %11, %12 in 1 : vector<8x8xf32>, vector<8x8xf32> -> vector<8x16xf32>
    %14 = vector.extract_strided_slice %8 {offsets = [0, 8], sizes = [8, 8], strides = [1, 1]} : vector<8x16xf32> to vector<8x8xf32>
    %15 = vector.extract_strided_slice %8 {offsets = [0, 0], sizes = [8, 8], strides = [1, 1]} : vector<8x16xf32> to vector<8x8xf32>
    %16 = tpu.concatenate %14, %15 in 1 : vector<8x8xf32>, vector<8x8xf32> -> vector<8x16xf32>
    %17 = vector.extract_strided_slice %9 {offsets = [0, 8], sizes = [8, 8], strides = [1, 1]} : vector<8x16xf32> to vector<8x8xf32>
    %18 = vector.extract_strided_slice %9 {offsets = [0, 0], sizes = [8, 8], strides = [1, 1]} : vector<8x16xf32> to vector<8x8xf32>
    %19 = tpu.concatenate %17, %18 in 1 : vector<8x8xf32>, vector<8x8xf32> -> vector<8x16xf32>
    %20 = vector.extract_strided_slice %10 {offsets = [0, 8], sizes = [8, 8], strides = [1, 1]} : vector<8x16xf32> to vector<8x8xf32>
    %21 = vector.extract_strided_slice %10 {offsets = [0, 0], sizes = [8, 8], strides = [1, 1]} : vector<8x16xf32> to vector<8x8xf32>
    %22 = tpu.concatenate %20, %21 in 1 : vector<8x8xf32>, vector<8x8xf32> -> vector<8x16xf32>
    %23 = vector.extract_strided_slice %2 {offsets = [0, 0, 0], sizes = [1, 1, 16], strides = [1, 1, 1]} : vector<4x4x16xf32> to vector<1x1x16xf32>
    %24 = vector.shape_cast %23 : vector<1x1x16xf32> to vector<1x16xf32>
    %25 = vector.broadcast %24 : vector<1x16xf32> to vector<8x16xf32>
    %26 = arith.mulf %7, %25 : vector<8x16xf32>
    %27 = vector.extract_strided_slice %3 {offsets = [0, 0, 0], sizes = [1, 1, 16], strides = [1, 1, 1]} : vector<4x4x16xf32> to vector<1x1x16xf32>
    %28 = vector.shape_cast %27 : vector<1x1x16xf32> to vector<1x16xf32>
    %29 = vector.broadcast %28 : vector<1x16xf32> to vector<8x16xf32>
    %30 = arith.mulf %13, %29 : vector<8x16xf32>
    %31 = arith.addf %26, %30 : vector<8x16xf32>
    %32 = vector.extract_strided_slice %2 {offsets = [1, 0, 0], sizes = [1, 1, 16], strides = [1, 1, 1]} : vector<4x4x16xf32> to vector<1x1x16xf32>
    %33 = vector.shape_cast %32 : vector<1x1x16xf32> to vector<1x16xf32>
    %34 = vector.broadcast %33 : vector<1x16xf32> to vector<8x16xf32>
    %35 = arith.mulf %8, %34 : vector<8x16xf32>
    %36 = arith.addf %31, %35 : vector<8x16xf32>
    %37 = vector.extract_strided_slice %3 {offsets = [1, 0, 0], sizes = [1, 1, 16], strides = [1, 1, 1]} : vector<4x4x16xf32> to vector<1x1x16xf32>
    %38 = vector.shape_cast %37 : vector<1x1x16xf32> to vector<1x16xf32>
    %39 = vector.broadcast %38 : vector<1x16xf32> to vector<8x16xf32>
    %40 = arith.mulf %16, %39 : vector<8x16xf32>
    %41 = arith.addf %36, %40 : vector<8x16xf32>
    %42 = vector.extract_strided_slice %2 {offsets = [2, 0, 0], sizes = [1, 1, 16], strides = [1, 1, 1]} : vector<4x4x16xf32> to vector<1x1x16xf32>
    %43 = vector.shape_cast %42 : vector<1x1x16xf32> to vector<1x16xf32>
    %44 = vector.broadcast %43 : vector<1x16xf32> to vector<8x16xf32>
    %45 = arith.mulf %9, %44 : vector<8x16xf32>
    %46 = arith.addf %41, %45 : vector<8x16xf32>
    %47 = vector.extract_strided_slice %3 {offsets = [2, 0, 0], sizes = [1, 1, 16], strides = [1, 1, 1]} : vector<4x4x16xf32> to vector<1x1x16xf32>
    %48 = vector.shape_cast %47 : vector<1x1x16xf32> to vector<1x16xf32>
    %49 = vector.broadcast %48 : vector<1x16xf32> to vector<8x16xf32>
    %50 = arith.mulf %19, %49 : vector<8x16xf32>
    %51 = arith.addf %46, %50 : vector<8x16xf32>
    %52 = vector.extract_strided_slice %2 {offsets = [3, 0, 0], sizes = [1, 1, 16], strides = [1, 1, 1]} : vector<4x4x16xf32> to vector<1x1x16xf32>
    %53 = vector.shape_cast %52 : vector<1x1x16xf32> to vector<1x16xf32>
    %54 = vector.broadcast %53 : vector<1x16xf32> to vector<8x16xf32>
    %55 = arith.mulf %10, %54 : vector<8x16xf32>
    %56 = arith.addf %51, %55 : vector<8x16xf32>
    %57 = vector.extract_strided_slice %3 {offsets = [3, 0, 0], sizes = [1, 1, 16], strides = [1, 1, 1]} : vector<4x4x16xf32> to vector<1x1x16xf32>
    %58 = vector.shape_cast %57 : vector<1x1x16xf32> to vector<1x16xf32>
    %59 = vector.broadcast %58 : vector<1x16xf32> to vector<8x16xf32>
    %60 = arith.mulf %22, %59 : vector<8x16xf32>
    %61 = arith.addf %56, %60 : vector<8x16xf32>
    %cst_12 = arith.constant dense<0.000000e+00> : vector<8x16xf32>
    %62 = tpu.matmul %61, %1, %cst_12 {dimension_numbers = #tpu.dot_dimension_numbers<[1], [0], [0], [1], [0, 0, 1, 1], [], []>} : vector<8x16xf32>, vector<16x16xf32>, vector<8x16xf32> -> vector<8x16xf32>
    %c0_13 = arith.constant 0 : index
    %c0_14 = arith.constant 0 : index
    %c0_15 = arith.constant 0 : index
    %63 = vector.load %arg6[%c0_13, %c0_14, %c0_15] : memref<4x8x16xf32, #tpu.memory_space<vmem>>, vector<1x8x16xf32>
    %64 = vector.shape_cast %63 : vector<1x8x16xf32> to vector<8x16xf32>
    %65 = vector.shape_cast %62 : vector<8x16xf32> to vector<1x8x16xf32>
    tpu.vector_store %arg6[%c0_13, %c0_14, %c0_15], %65 {strides = array<i32>} : memref<4x8x16xf32, #tpu.memory_space<vmem>>, vector<1x8x16xf32>,
    %66 = vector.extract_strided_slice %2 {offsets = [0, 1, 0], sizes = [1, 1, 16], strides = [1, 1, 1]} : vector<4x4x16xf32> to vector<1x1x16xf32>
    %67 = vector.shape_cast %66 : vector<1x1x16xf32> to vector<1x16xf32>
    %68 = vector.broadcast %67 : vector<1x16xf32> to vector<8x16xf32>
    %69 = arith.mulf %7, %68 : vector<8x16xf32>
    %70 = vector.extract_strided_slice %3 {offsets = [0, 1, 0], sizes = [1, 1, 16], strides = [1, 1, 1]} : vector<4x4x16xf32> to vector<1x1x16xf32>
    %71 = vector.shape_cast %70 : vector<1x1x16xf32> to vector<1x16xf32>
    %72 = vector.broadcast %71 : vector<1x16xf32> to vector<8x16xf32>
    %73 = arith.mulf %13, %72 : vector<8x16xf32>
    %74 = arith.addf %69, %73 : vector<8x16xf32>
    %75 = vector.extract_strided_slice %2 {offsets = [1, 1, 0], sizes = [1, 1, 16], strides = [1, 1, 1]} : vector<4x4x16xf32> to vector<1x1x16xf32>
    %76 = vector.shape_cast %75 : vector<1x1x16xf32> to vector<1x16xf32>
    %77 = vector.broadcast %76 : vector<1x16xf32> to vector<8x16xf32>
    %78 = arith.mulf %8, %77 : vector<8x16xf32>
    %79 = arith.addf %74, %78 : vector<8x16xf32>
    %80 = vector.extract_strided_slice %3 {offsets = [1, 1, 0], sizes = [1, 1, 16], strides = [1, 1, 1]} : vector<4x4x16xf32> to vector<1x1x16xf32>
    %81 = vector.shape_cast %80 : vector<1x1x16xf32> to vector<1x16xf32>
    %82 = vector.broadcast %81 : vector<1x16xf32> to vector<8x16xf32>
    %83 = arith.mulf %16, %82 : vector<8x16xf32>
    %84 = arith.addf %79, %83 : vector<8x16xf32>
    %85 = vector.extract_strided_slice %2 {offsets = [2, 1, 0], sizes = [1, 1, 16], strides = [1, 1, 1]} : vector<4x4x16xf32> to vector<1x1x16xf32>
    %86 = vector.shape_cast %85 : vector<1x1x16xf32> to vector<1x16xf32>
    %87 = vector.broadcast %86 : vector<1x16xf32> to vector<8x16xf32>
    %88 = arith.mulf %9, %87 : vector<8x16xf32>
    %89 = arith.addf %84, %88 : vector<8x16xf32>
    %90 = vector.extract_strided_slice %3 {offsets = [2, 1, 0], sizes = [1, 1, 16], strides = [1, 1, 1]} : vector<4x4x16xf32> to vector<1x1x16xf32>
    %91 = vector.shape_cast %90 : vector<1x1x16xf32> to vector<1x16xf32>
    %92 = vector.broadcast %91 : vector<1x16xf32> to vector<8x16xf32>
    %93 = arith.mulf %19, %92 : vector<8x16xf32>
    %94 = arith.addf %89, %93 : vector<8x16xf32>
    %95 = vector.extract_strided_slice %2 {offsets = [3, 1, 0], sizes = [1, 1, 16], strides = [1, 1, 1]} : vector<4x4x16xf32> to vector<1x1x16xf32>
    %96 = vector.shape_cast %95 : vector<1x1x16xf32> to vector<1x16xf32>
    %97 = vector.broadcast %96 : vector<1x16xf32> to vector<8x16xf32>
    %98 = arith.mulf %10, %97 : vector<8x16xf32>
    %99 = arith.addf %94, %98 : vector<8x16xf32>
    %100 = vector.extract_strided_slice %3 {offsets = [3, 1, 0], sizes = [1, 1, 16], strides = [1, 1, 1]} : vector<4x4x16xf32> to vector<1x1x16xf32>
    %101 = vector.shape_cast %100 : vector<1x1x16xf32> to vector<1x16xf32>
    %102 = vector.broadcast %101 : vector<1x16xf32> to vector<8x16xf32>
    %103 = arith.mulf %22, %102 : vector<8x16xf32>
    %104 = arith.addf %99, %103 : vector<8x16xf32>
    %cst_16 = arith.constant dense<0.000000e+00> : vector<8x16xf32>
    %105 = tpu.matmul %104, %1, %cst_16 {dimension_numbers = #tpu.dot_dimension_numbers<[1], [0], [0], [1], [0, 0, 1, 1], [], []>} : vector<8x16xf32>, vector<16x16xf32>, vector<8x16xf32> -> vector<8x16xf32>
    %c1 = arith.constant 1 : index
    %c0_17 = arith.constant 0 : index
    %c0_18 = arith.constant 0 : index
    %106 = vector.load %arg6[%c1, %c0_17, %c0_18] : memref<4x8x16xf32, #tpu.memory_space<vmem>>, vector<1x8x16xf32>
    %107 = vector.shape_cast %106 : vector<1x8x16xf32> to vector<8x16xf32>
    %108 = vector.shape_cast %105 : vector<8x16xf32> to vector<1x8x16xf32>
    tpu.vector_store %arg6[%c1, %c0_17, %c0_18], %108 {strides = array<i32>} : memref<4x8x16xf32, #tpu.memory_space<vmem>>, vector<1x8x16xf32>,
    %109 = vector.extract_strided_slice %2 {offsets = [0, 2, 0], sizes = [1, 1, 16], strides = [1, 1, 1]} : vector<4x4x16xf32> to vector<1x1x16xf32>
    %110 = vector.shape_cast %109 : vector<1x1x16xf32> to vector<1x16xf32>
    %111 = vector.broadcast %110 : vector<1x16xf32> to vector<8x16xf32>
    %112 = arith.mulf %7, %111 : vector<8x16xf32>
    %113 = vector.extract_strided_slice %3 {offsets = [0, 2, 0], sizes = [1, 1, 16], strides = [1, 1, 1]} : vector<4x4x16xf32> to vector<1x1x16xf32>
    %114 = vector.shape_cast %113 : vector<1x1x16xf32> to vector<1x16xf32>
    %115 = vector.broadcast %114 : vector<1x16xf32> to vector<8x16xf32>
    %116 = arith.mulf %13, %115 : vector<8x16xf32>
    %117 = arith.addf %112, %116 : vector<8x16xf32>
    %118 = vector.extract_strided_slice %2 {offsets = [1, 2, 0], sizes = [1, 1, 16], strides = [1, 1, 1]} : vector<4x4x16xf32> to vector<1x1x16xf32>
    %119 = vector.shape_cast %118 : vector<1x1x16xf32> to vector<1x16xf32>
    %120 = vector.broadcast %119 : vector<1x16xf32> to vector<8x16xf32>
    %121 = arith.mulf %8, %120 : vector<8x16xf32>
    %122 = arith.addf %117, %121 : vector<8x16xf32>
    %123 = vector.extract_strided_slice %3 {offsets = [1, 2, 0], sizes = [1, 1, 16], strides = [1, 1, 1]} : vector<4x4x16xf32> to vector<1x1x16xf32>
    %124 = vector.shape_cast %123 : vector<1x1x16xf32> to vector<1x16xf32>
    %125 = vector.broadcast %124 : vector<1x16xf32> to vector<8x16xf32>
    %126 = arith.mulf %16, %125 : vector<8x16xf32>
    %127 = arith.addf %122, %126 : vector<8x16xf32>
    %128 = vector.extract_strided_slice %2 {offsets = [2, 2, 0], sizes = [1, 1, 16], strides = [1, 1, 1]} : vector<4x4x16xf32> to vector<1x1x16xf32>
    %129 = vector.shape_cast %128 : vector<1x1x16xf32> to vector<1x16xf32>
    %130 = vector.broadcast %129 : vector<1x16xf32> to vector<8x16xf32>
    %131 = arith.mulf %9, %130 : vector<8x16xf32>
    %132 = arith.addf %127, %131 : vector<8x16xf32>
    %133 = vector.extract_strided_slice %3 {offsets = [2, 2, 0], sizes = [1, 1, 16], strides = [1, 1, 1]} : vector<4x4x16xf32> to vector<1x1x16xf32>
    %134 = vector.shape_cast %133 : vector<1x1x16xf32> to vector<1x16xf32>
    %135 = vector.broadcast %134 : vector<1x16xf32> to vector<8x16xf32>
    %136 = arith.mulf %19, %135 : vector<8x16xf32>
    %137 = arith.addf %132, %136 : vector<8x16xf32>
    %138 = vector.extract_strided_slice %2 {offsets = [3, 2, 0], sizes = [1, 1, 16], strides = [1, 1, 1]} : vector<4x4x16xf32> to vector<1x1x16xf32>
    %139 = vector.shape_cast %138 : vector<1x1x16xf32> to vector<1x16xf32>
    %140 = vector.broadcast %139 : vector<1x16xf32> to vector<8x16xf32>
    %141 = arith.mulf %10, %140 : vector<8x16xf32>
    %142 = arith.addf %137, %141 : vector<8x16xf32>
    %143 = vector.extract_strided_slice %3 {offsets = [3, 2, 0], sizes = [1, 1, 16], strides = [1, 1, 1]} : vector<4x4x16xf32> to vector<1x1x16xf32>
    %144 = vector.shape_cast %143 : vector<1x1x16xf32> to vector<1x16xf32>
    %145 = vector.broadcast %144 : vector<1x16xf32> to vector<8x16xf32>
    %146 = arith.mulf %22, %145 : vector<8x16xf32>
    %147 = arith.addf %142, %146 : vector<8x16xf32>
    %cst_19 = arith.constant dense<0.000000e+00> : vector<8x16xf32>
    %148 = tpu.matmul %147, %1, %cst_19 {dimension_numbers = #tpu.dot_dimension_numbers<[1], [0], [0], [1], [0, 0, 1, 1], [], []>} : vector<8x16xf32>, vector<16x16xf32>, vector<8x16xf32> -> vector<8x16xf32>
    %c2 = arith.constant 2 : index
    %c0_20 = arith.constant 0 : index
    %c0_21 = arith.constant 0 : index
    %149 = vector.load %arg6[%c2, %c0_20, %c0_21] : memref<4x8x16xf32, #tpu.memory_space<vmem>>, vector<1x8x16xf32>
    %150 = vector.shape_cast %149 : vector<1x8x16xf32> to vector<8x16xf32>
    %151 = vector.shape_cast %148 : vector<8x16xf32> to vector<1x8x16xf32>
    tpu.vector_store %arg6[%c2, %c0_20, %c0_21], %151 {strides = array<i32>} : memref<4x8x16xf32, #tpu.memory_space<vmem>>, vector<1x8x16xf32>,
    %152 = vector.extract_strided_slice %2 {offsets = [0, 3, 0], sizes = [1, 1, 16], strides = [1, 1, 1]} : vector<4x4x16xf32> to vector<1x1x16xf32>
    %153 = vector.shape_cast %152 : vector<1x1x16xf32> to vector<1x16xf32>
    %154 = vector.broadcast %153 : vector<1x16xf32> to vector<8x16xf32>
    %155 = arith.mulf %7, %154 : vector<8x16xf32>
    %156 = vector.extract_strided_slice %3 {offsets = [0, 3, 0], sizes = [1, 1, 16], strides = [1, 1, 1]} : vector<4x4x16xf32> to vector<1x1x16xf32>
    %157 = vector.shape_cast %156 : vector<1x1x16xf32> to vector<1x16xf32>
    %158 = vector.broadcast %157 : vector<1x16xf32> to vector<8x16xf32>
    %159 = arith.mulf %13, %158 : vector<8x16xf32>
    %160 = arith.addf %155, %159 : vector<8x16xf32>
    %161 = vector.extract_strided_slice %2 {offsets = [1, 3, 0], sizes = [1, 1, 16], strides = [1, 1, 1]} : vector<4x4x16xf32> to vector<1x1x16xf32>
    %162 = vector.shape_cast %161 : vector<1x1x16xf32> to vector<1x16xf32>
    %163 = vector.broadcast %162 : vector<1x16xf32> to vector<8x16xf32>
    %164 = arith.mulf %8, %163 : vector<8x16xf32>
    %165 = arith.addf %160, %164 : vector<8x16xf32>
    %166 = vector.extract_strided_slice %3 {offsets = [1, 3, 0], sizes = [1, 1, 16], strides = [1, 1, 1]} : vector<4x4x16xf32> to vector<1x1x16xf32>
    %167 = vector.shape_cast %166 : vector<1x1x16xf32> to vector<1x16xf32>
    %168 = vector.broadcast %167 : vector<1x16xf32> to vector<8x16xf32>
    %169 = arith.mulf %16, %168 : vector<8x16xf32>
    %170 = arith.addf %165, %169 : vector<8x16xf32>
    %171 = vector.extract_strided_slice %2 {offsets = [2, 3, 0], sizes = [1, 1, 16], strides = [1, 1, 1]} : vector<4x4x16xf32> to vector<1x1x16xf32>
    %172 = vector.shape_cast %171 : vector<1x1x16xf32> to vector<1x16xf32>
    %173 = vector.broadcast %172 : vector<1x16xf32> to vector<8x16xf32>
    %174 = arith.mulf %9, %173 : vector<8x16xf32>
    %175 = arith.addf %170, %174 : vector<8x16xf32>
    %176 = vector.extract_strided_slice %3 {offsets = [2, 3, 0], sizes = [1, 1, 16], strides = [1, 1, 1]} : vector<4x4x16xf32> to vector<1x1x16xf32>
    %177 = vector.shape_cast %176 : vector<1x1x16xf32> to vector<1x16xf32>
    %178 = vector.broadcast %177 : vector<1x16xf32> to vector<8x16xf32>
    %179 = arith.mulf %19, %178 : vector<8x16xf32>
    %180 = arith.addf %175, %179 : vector<8x16xf32>
    %181 = vector.extract_strided_slice %2 {offsets = [3, 3, 0], sizes = [1, 1, 16], strides = [1, 1, 1]} : vector<4x4x16xf32> to vector<1x1x16xf32>
    %182 = vector.shape_cast %181 : vector<1x1x16xf32> to vector<1x16xf32>
    %183 = vector.broadcast %182 : vector<1x16xf32> to vector<8x16xf32>
    %184 = arith.mulf %10, %183 : vector<8x16xf32>
    %185 = arith.addf %180, %184 : vector<8x16xf32>
    %186 = vector.extract_strided_slice %3 {offsets = [3, 3, 0], sizes = [1, 1, 16], strides = [1, 1, 1]} : vector<4x4x16xf32> to vector<1x1x16xf32>
    %187 = vector.shape_cast %186 : vector<1x1x16xf32> to vector<1x16xf32>
    %188 = vector.broadcast %187 : vector<1x16xf32> to vector<8x16xf32>
    %189 = arith.mulf %22, %188 : vector<8x16xf32>
    %190 = arith.addf %185, %189 : vector<8x16xf32>
    %cst_22 = arith.constant dense<0.000000e+00> : vector<8x16xf32>
    %191 = tpu.matmul %190, %1, %cst_22 {dimension_numbers = #tpu.dot_dimension_numbers<[1], [0], [0], [1], [0, 0, 1, 1], [], []>} : vector<8x16xf32>, vector<16x16xf32>, vector<8x16xf32> -> vector<8x16xf32>
    %c3 = arith.constant 3 : index
    %c0_23 = arith.constant 0 : index
    %c0_24 = arith.constant 0 : index
    %192 = vector.load %arg6[%c3, %c0_23, %c0_24] : memref<4x8x16xf32, #tpu.memory_space<vmem>>, vector<1x8x16xf32>
    %193 = vector.shape_cast %192 : vector<1x8x16xf32> to vector<8x16xf32>
    %194 = vector.shape_cast %191 : vector<8x16xf32> to vector<1x8x16xf32>
    tpu.vector_store %arg6[%c3, %c0_23, %c0_24], %194 {strides = array<i32>} : memref<4x8x16xf32, #tpu.memory_space<vmem>>, vector<1x8x16xf32>,
    return
  }
  func.func @transform_0(%arg0: i32) -> (i32, i32, i32) {
    %c0_i32 = arith.constant 0 : i32
    %c0_i32_0 = arith.constant 0 : i32
    %c0_i32_1 = arith.constant 0 : i32
    return %c0_i32, %arg0, %c0_i32_0 : i32, i32, i32
  }
  func.func @transform_1(%arg0: i32) -> (i32, i32) {
    %c0_i32 = arith.constant 0 : i32
    %c0_i32_0 = arith.constant 0 : i32
    %c0_i32_1 = arith.constant 0 : i32
    return %c0_i32, %c0_i32_0 : i32, i32
  }
  func.func @transform_2(%arg0: i32) -> (i32, i32) {
    %c0_i32 = arith.constant 0 : i32
    %c0_i32_0 = arith.constant 0 : i32
    %c0_i32_1 = arith.constant 0 : i32
    return %c0_i32, %c0_i32_0 : i32, i32
  }
  func.func @transform_3(%arg0: i32) -> (i32, i32, i32) {
    %c0_i32 = arith.constant 0 : i32
    %c0_i32_0 = arith.constant 0 : i32
    %c0_i32_1 = arith.constant 0 : i32
    %c0_i32_2 = arith.constant 0 : i32
    return %c0_i32, %c0_i32_0, %c0_i32_1 : i32, i32, i32
  }
  func.func @transform_4(%arg0: i32) -> (i32, i32, i32) {
    %c0_i32 = arith.constant 0 : i32
    %c0_i32_0 = arith.constant 0 : i32
    %c0_i32_1 = arith.constant 0 : i32
    %c0_i32_2 = arith.constant 0 : i32
    return %c0_i32, %c0_i32_0, %c0_i32_1 : i32, i32, i32
  }
  func.func @transform_5(%arg0: i32) -> (i32, i32, i32) {
    %c0_i32 = arith.constant 0 : i32
    %c0_i32_0 = arith.constant 0 : i32
    %c0_i32_1 = arith.constant 0 : i32
    return %c0_i32, %arg0, %c0_i32_0 : i32, i32, i32
  }
}

</mosaic_0001>

<bundles_post_ra>
// kernel: tpu_custom_call.1
= control target key start
LH: loop header
LB: loop body
LE: loop exit
PB: predicated region body
PF: predicated region fallthrough
CT: control target
= control target key end

     0   :  { %s768_s18 = smov 0   ;;  %s770_s19 = smov 0   ;;  %s906_s0 = inlined_call_operand.vmem [shape: f32[4,32,16], index: 0, kind: input, shape index: {}]   ;;  %s907_s1 = inlined_call_operand.vmem [shape: f32[16,16], index: 1, kind: input, shape index: {}]   ;;  %s908_s2 = inlined_call_operand.vmem [shape: f32[16,16], index: 2, kind: input, shape index: {}]   ;;  %s909_s3 = inlined_call_operand.vmem [shape: f32[4,4,16], index: 3, kind: input, shape index: {}]   ;;  %s910_s4 = inlined_call_operand.vmem [shape: f32[4,4,16], index: 4, kind: input, shape index: {}]   ;;  %s911_s5 = inlined_call_operand.vmem [shape: f32[4,32,16], index: 5, kind: output, shape index: {}]  }
   0x1   :  { %s772_s20 = smov 0  }
   0x2 LB: > { %s658_s21 = sadd.s32 4294967295, %s734_s20   ;;  %s785_s22 = sadd.s32 1, %s734_s20   ;;  %s734_s20 = sphi %s772_s20, %s915_s20   ;;  %s730_s19 = sphi %s770_s19, %s914_s19   ;;  %s726_s18 = sphi %s768_s18, %s913_s18  }
   0x3   : > { %s19_s23 = ssub.s32 %s734_s20, %s785_s22  ;;  %s22_s24 = sadd.s32 1, %s730_s19 }
   0x4   : > { %p20_p0 = scmp.eq.s32.totalorder %s19_s23, 0  ;;  %p29_p1 = scmp.ne.s32.totalorder %s730_s19, %s726_s18 }
   0x5   : > { %p30_p2 = scmp.eq.s32.totalorder %s734_s20, 0  ;;  %p143_p3 = scmp.eq.s32.totalorder %s658_s21, 3 }
   0x6   : > { %s796_s25 = scalar_select %p20_p0, %s730_s19, %s22_s24  }
   0x7   : > { %p31_p4 = por %p30_p2, %p29_p1  ;;  %p798_p5 = por %p143_p3, %p29_p1 }
   0x8   : > { %p661_p6 = scmp.ge.s32.totalorder %s734_s20, 4 }
   0xa   : > { %177 = sbr.rel (%p661_p6) target bundleno = 23 (0x17), region = 32 }
   0xf   : > { %180 = sbr.rel (!%p31_p4) target bundleno = 23 (0x17), region = 36  ;;  %s182_s27 = sand.u32 (%p31_p4), 1, %s730_s19  }
  0x10   : > { %s663_s28 = sshll.u32 (%p31_p4), %s734_s20, 3  ;;  %s662_s29 = sshll.u32 (%p31_p4), %s182_s27, 5 }
  0x11   : > { %s186_s7 = scalar_lea.vmem (%p31_p4), %s906_s0, %s663_s28  ;;  %s184_s8 = scalar_lea.vmem (%p31_p4), [#allocation2], %s662_s29 }
  0x12   : > { %v221_v0 = vld [vmem:[%s186_s7] sm:$0xff] (%p31_p4) }
  0x13   : > { %v223_v1 = vld [vmem:[%s186_s7 + $0x20] sm:$0xff] (%p31_p4)  ;;  %222 = vst [vmem:[%s184_s8] sm:$0xff] (%p31_p4), %v221_v0 }
  0x14   : > { %v225_v2 = vld [vmem:[%s186_s7 + $0x40] sm:$0xff]  ;;  %224 = vst [vmem:[%s184_s8 + $0x8] sm:$0xff] %v223_v1 }
  0x15   : > { %v227_v3 = vld [vmem:[%s186_s7 + $0x60] sm:$0xff]  ;;  %226 = vst [vmem:[%s184_s8 + $0x10] sm:$0xff] %v225_v2 }
  0x16   : > { %228 = vst [vmem:[%s184_s8 + $0x18] sm:$0xff] %v227_v3 }
  0x17 PF: > { %p664_p7 = scmp.ge.s32.totalorder %s734_s20, 1  ;;  %p233_p8 = scmp.lt.s32.totalorder %s734_s20, 5 }
  0x19   : > { %p234_p9 = pnand %p664_p7, %p233_p8 }
  0x1a   : > { %s240_s13 = sand.u32 (!%p234_p9), 1, %s726_s18   ;;  %s736_s16 = smov (!%p234_p9), 120  }
  0x1b   : > { %237 = sbr.rel (%p234_p9) target bundleno = 450 (0x1c2), region = 74  ;;  %s817_s14 = sshll.u32 (!%p234_p9), %s240_s13, 5 }
  0x1c   : > { %s242_s15 = scalar_lea.vmem (!%p234_p9), [#allocation2], %s817_s14  ;;  %s737_s17 = smov (!%p234_p9), 8  }
  0x1d   : > { %s265_s24 = scalar_lea.vmem (!%p234_p9), [#allocation3], %s817_s14 }
  0x20   : > { %v267_v4 = vld [vmem:[%s907_s1 + $0x8] sm:$0xff]  ;;  %v266_v5 = vld [vmem:[%s907_s1] sm:$0xff]  ;;  %vm282_vm0 = vcmask 130048   ;;  %v281_v7 = vld [vmem:[%s242_s15 + $0x18] sm:$0xff]  ;;  %vm331_vm1 = vcmask 64512   ;;  %s679_s27 = sshll.u32 (%p798_p5), %s658_s21, 3 }
  0x21   : > { %309 = vmatpush.msra.mxu0 %v267_v4  ;;  %683 = vmatpush.msra.mxu3 %v267_v4  ;;  %v278_v6 = vld [vmem:[%s242_s15] sm:$0xff]  ;;  %v280_v8 = vld [vmem:[%s242_s15 + $0x10] sm:$0xff]  ;;  %v279_v9 = vld [vmem:[%s242_s15 + $0x8] sm:$0xff]  ;;  %s556_s29 = scalar_lea.vmem (%p798_p5), %s911_s5, %s679_s27 }
  0x22   : > { %682 = vmatpush.msra.mxu2 %v267_v4  ;;  %v269_v14 = vld [vmem:[%s908_s2 + $0x8] sm:$0xff]  ;;  %v268_v15 = vld [vmem:[%s908_s2] sm:$0xff] }
  0x23   : > { %310 = vmatpush.msra.mxu0 %v266_v5  ;;  %685 = vmatpush.msra.mxu3 %v266_v5  ;;  %v270_v17 = vld [vmem:[%s909_s3] sm:$0xf]  ;;  %v271_v19 = vld [vmem:[%s909_s3 + $0x4] sm:$0xf]  ;;  %v272_v53 = vld [vmem:[%s909_s3 + $0x8] sm:$0xf] }
  0x24   : > { %667 = vmatmul.msk.f32.vlgmr.msra.gmra.mxu0 %vm282_vm0, %v278_v6  ;;  %670 = vmatmul.msk.f32.vlgmr.msra.gmra.mxu3 %vm282_vm0, %v281_v7  ;;  %v274_v18 = vld [vmem:[%s910_s4] sm:$0xf]  ;;  %v357_v20 = vperm.slane %v270_v17, 0  ;;  %v404_v22 = vperm.slane %v270_v17, 1  ;;  %v452_v23 = vperm.slane %v270_v17, 2  ;;  %v500_v24 = vperm.slane %v270_v17, 3 }
  0x25   : > { %684 = vmatpush.msra.mxu2 %v266_v5  ;;  %492 = vmatpush.msrb.mxu3 %v269_v14  ;;  %v359_v25 = vperm.slane %v274_v18, 0  ;;  %v406_v26 = vperm.slane %v274_v18, 1  ;;  %v454_v27 = vperm.slane %v274_v18, 2  ;;  %v502_v28 = vperm.slane %v274_v18, 3  ;;  %v275_v52 = vld [vmem:[%s910_s4 + $0x4] sm:$0xf] }
  0x26   : > { %669 = vmatmul.msk.f32.vlgmr.msra.gmra.mxu2 %vm282_vm0, %v280_v8  ;;  %397 = vmatpush.msra.mxu1 %v269_v14  ;;  %v362_v29 = vperm.slane %v271_v19, 0  ;;  %v409_v30 = vperm.slane %v271_v19, 1  ;;  %v457_v31 = vperm.slane %v271_v19, 2  ;;  %v505_v32 = vperm.slane %v271_v19, 3  ;;  %v857_v54 = vld [vmem:[%s909_s3 + $0xc] sm:$0xf] }
  0x27   : > { %444 = vmatpush.msrb.mxu2 %v269_v14  ;;  %493 = vmatpush.msrb.mxu3 %v268_v15  ;;  %v276_v55 = vld [vmem:[%s910_s4 + $0x8] sm:$0xf]  ;;  %v365_v61 = vperm.slane %v275_v52, 0  ;;  %v412_v62 = vperm.slane %v275_v52, 1  ;;  %v460_v63 = vperm.slane %v275_v52, 2  ;;  %v508_v0 = vperm.slane %v275_v52, 3 }
  0x28   : > { %398 = vmatpush.msra.mxu1 %v268_v15  ;;  %v368_v1 = vperm.slane %v272_v53, 0  ;;  %v415_v2 = vperm.slane %v272_v53, 1  ;;  %v463_v3 = vperm.slane %v272_v53, 2  ;;  %v374_v4 = vperm.slane %v857_v54, 0  ;;  %v277_v8 = vld [vmem:[%s910_s4 + $0xc] sm:$0xf] }
  0x29   : > { %445 = vmatpush.msrb.mxu2 %v268_v15  ;;  %v371_v5 = vperm.slane %v276_v55, 0  ;;  %v511_v6 = vperm.slane %v272_v53, 3  ;;  %v517_v52 = vperm.slane %v857_v54, 3 }
  0x2a   : > { %540 = vmatpush.msrb.mxu1 %v269_v14  ;;  %v466_v14 = vperm.slane %v276_v55, 2 }
  0x2c   : > { %668 = vmatmul.msk.f32.gmra.mxu0 %vm282_vm0, %v279_v9  ;;  %541 = vmatpush.msrb.mxu1 %v268_v15  ;;  %v421_v9 = vperm.slane %v857_v54, 1 }
  0xa1   : > { %v312_v10 = vpop.f32.mrf.mxu0 }
  0xa2   : > { %325 = vrot.lane.b32.xlu0 %v312_v10, %s736_s16  ;;  %v358_v34 = vmul.f32 %v357_v20, %v312_v10  ;;  %v405_v36 = vmul.f32 %v404_v22, %v312_v10  ;;  %v453_v37 = vmul.f32 %v452_v23, %v312_v10  ;;  %v501_v38 = vmul.f32 %v500_v24, %v312_v10 }
  0xa7   : > { %v827_v13 = vpop.f32.mrf.mxu3 }
  0xa9   : > { %v315_v11 = vpop.f32.mrf.mxu0  ;;  %v824_v12 = vpop.f32.mrf.mxu2 }
  0xaa   : > { %328 = vrot.lane.b32.xlu0 %v312_v10, %s737_s17  ;;  %334 = vrot.lane.b32.xlu1 %v315_v11, %s736_s16  ;;  %v363_v44 = vmul.f32 %v362_v29, %v315_v11  ;;  %v410_v45 = vmul.f32 %v409_v30, %v315_v11  ;;  %v458_v46 = vmul.f32 %v457_v31, %v315_v11  ;;  %v469_v10 = vperm.slane %v857_v54, 2 }
  0xab   : > { %342 = vrot.lane.b32.xlu2 %v824_v12, %s736_s16  ;;  %v506_v47 = vmul.f32 %v505_v32, %v315_v11  ;;  %v369_v22 = vmul.f32 %v368_v1, %v824_v12  ;;  %v416_v23 = vmul.f32 %v415_v2, %v824_v12  ;;  %v464_v24 = vmul.f32 %v463_v3, %v824_v12 }
  0xac   : > { %v424_v29 = vperm.slane %v277_v8, 1  ;;  %v472_v32 = vperm.slane %v277_v8, 2 }
  0xb2   : > { %350 = vrot.lane.b32.xlu0 %v827_v13, %s736_s16  ;;  %337 = vrot.lane.b32.xlu1 %v315_v11, %s737_s17  ;;  %v418_v11 = vperm.slane %v276_v55, 1 }
  0xb3   : > { %345 = vrot.lane.b32.xlu2 %v824_v12, %s737_s17 }
  0xba   : > { %353 = vrot.lane.b32.xlu1 %v827_v13, %s737_s17 }
 0x105   : > { %v343_v21 = vpop.permute.xlu2 %342 }
 0x10d   : > { %v346_v60 = vpop.permute.xlu2 %345 }
 0x10e   : > { %v348_v15 = vsel %vm331_vm1, %v343_v21, %v346_v60 }
 0x10f   : > { %v372_v30 = vmul.f32 %v371_v5, %v348_v15  ;;  %v419_v31 = vmul.f32 %v418_v11, %v348_v15 }
 0x114   : > { %v326_v16 = vpop.permute.xlu0 %325 }
 0x11c   : > { %v329_v33 = vpop.permute.xlu0 %328  ;;  %v335_v39 = vpop.permute.xlu1 %334 }
 0x11d   : > { %v332_v35 = vsel %vm331_vm1, %v326_v16, %v329_v33  ;;  %v467_v33 = vmul.f32 %v466_v14, %v348_v15 }
 0x11e   : > { %v360_v40 = vmul.f32 %v359_v25, %v332_v35  ;;  %v407_v41 = vmul.f32 %v406_v26, %v332_v35  ;;  %v455_v42 = vmul.f32 %v454_v27, %v332_v35  ;;  %v503_v43 = vmul.f32 %v502_v28, %v332_v35 }
 0x11f   : > { %v377_v25 = vperm.slane %v277_v8, 0 }
 0x120   : > { %v361_v48 = vadd.f32 %v360_v40, %v358_v34  ;;  %v408_v49 = vadd.f32 %v407_v41, %v405_v36  ;;  %v456_v50 = vadd.f32 %v455_v42, %v453_v37  ;;  %v504_v51 = vadd.f32 %v503_v43, %v501_v38 }
 0x121   : > { %v514_v38 = vperm.slane %v276_v55, 3  ;;  %v375_v42 = vmul.f32 %v374_v4, %v827_v13 }
 0x122   : > { %v364_v56 = vadd.f32 %v363_v44, %v361_v48  ;;  %v411_v57 = vadd.f32 %v410_v45, %v408_v49  ;;  %v459_v58 = vadd.f32 %v458_v46, %v456_v50  ;;  %v507_v59 = vadd.f32 %v506_v47, %v504_v51 }
 0x123   : > { %v422_v47 = vmul.f32 %v421_v9, %v827_v13  ;;  %v470_v48 = vmul.f32 %v469_v10, %v827_v13  ;;  %v515_v53 = vmul.f32 %v514_v38, %v348_v15 }
 0x124   : > { %v338_v7 = vpop.permute.xlu1 %337  ;;  %v351_v37 = vpop.permute.xlu0 %350 }
 0x125   : > { %v340_v16 = vsel %vm331_vm1, %v335_v39, %v338_v7  ;;  %v512_v39 = vmul.f32 %v511_v6, %v824_v12 }
 0x126   : > { %v366_v17 = vmul.f32 %v365_v61, %v340_v16  ;;  %v413_v18 = vmul.f32 %v412_v62, %v340_v16  ;;  %v461_v19 = vmul.f32 %v460_v63, %v340_v16  ;;  %v509_v20 = vmul.f32 %v508_v0, %v340_v16 }
 0x127   : > { %v518_v62 = vmul.f32 %v517_v52, %v827_v13 }
 0x128   : > { %v367_v26 = vadd.f32 %v366_v17, %v364_v56  ;;  %v414_v27 = vadd.f32 %v413_v18, %v411_v57  ;;  %v462_v28 = vadd.f32 %v461_v19, %v459_v58  ;;  %v510_v21 = vadd.f32 %v509_v20, %v507_v59 }
 0x129   : > { %v520_v57 = vperm.slane %v277_v8, 3 }
 0x12a   : > { %v370_v34 = vadd.f32 %v369_v22, %v367_v26  ;;  %v417_v35 = vadd.f32 %v416_v23, %v414_v27  ;;  %v465_v36 = vadd.f32 %v464_v24, %v462_v28  ;;  %v513_v45 = vadd.f32 %v512_v39, %v510_v21 }
 0x12c   : > { %v354_v40 = vpop.permute.xlu1 %353  ;;  %v373_v41 = vadd.f32 %v372_v30, %v370_v34  ;;  %v420_v43 = vadd.f32 %v419_v31, %v417_v35  ;;  %v468_v44 = vadd.f32 %v467_v33, %v465_v36  ;;  %v516_v61 = vadd.f32 %v515_v53, %v513_v45 }
 0x12d   : > { %v356_v46 = vsel %vm331_vm1, %v351_v37, %v354_v40 }
 0x12e   : > { %v378_v49 = vmul.f32 %v377_v25, %v356_v46  ;;  %v425_v50 = vmul.f32 %v424_v29, %v356_v46  ;;  %v473_v51 = vmul.f32 %v472_v32, %v356_v46  ;;  %v376_v12 = vadd.f32 %v375_v42, %v373_v41 }
 0x12f   : > { %v423_v55 = vadd.f32 %v422_v47, %v420_v43  ;;  %v471_v56 = vadd.f32 %v470_v48, %v468_v44  ;;  %v521_v63 = vmul.f32 %v520_v57, %v356_v46  ;;  %v519_v54 = vadd.f32 %v518_v62, %v516_v61 }
 0x130   : > { %v379_v58 = vadd.f32 %v378_v49, %v376_v12 }
 0x131   : > { %v426_v59 = vadd.f32 %v425_v50, %v423_v55  ;;  %v474_v60 = vadd.f32 %v473_v51, %v471_v56  ;;  %v522_v0 = vadd.f32 %v521_v63, %v519_v54 }
 0x132   : > { %671 = vmatmul.msk.f32.vlgmr.msra.gmra.mxu1 %vm282_vm0, %v379_v58 }
 0x133   : > { %672 = vmatmul.msk.f32.vlgmr.msrb.gmra.mxu2 %vm282_vm0, %v426_v59  ;;  %674 = vmatmul.msk.f32.vlgmr.msrb.gmra.mxu3 %vm282_vm0, %v474_v60 }
 0x13a   : > { %676 = vmatmul.msk.f32.vlgmr.msrb.gmra.mxu1 %vm282_vm0, %v522_v0 }
 0x1af   : > { %v400_v1 = vpop.f32.mrf.mxu1 }
 0x1b0   : > { %403 = vst.msk [vmem:[%s265_s24] sm:$0xff] %vm282_vm0, %v400_v1 }
 0x1b5   : > { %554 = sbr.rel (!%p798_p5) target bundleno = 450 (0x1c2), region = 82 }
 0x1b6   : > { %v447_v2 = vpop.f32.mrf.mxu2  ;;  %v495_v3 = vpop.f32.mrf.mxu3 }
 0x1b7   : > { %673 = vst.msk [vmem:[%s265_s24 + $0x8] sm:$0xff] %vm282_vm0, %v447_v2  ;;  %v543_v4 = vpop.f32.mrf.mxu1  ;;  %v591_v13 = vld [vmem:[%s265_s24] sm:$0xff] (%p798_p5) }
 0x1b8   : > { %675 = vst.msk [vmem:[%s265_s24 + $0x10] sm:$0xff] %vm282_vm0, %v495_v3 }
 0x1b9   : > { %677 = vst.msk [vmem:[%s265_s24 + $0x18] sm:$0xff] %vm282_vm0, %v543_v4 }
 0x1ba   : > { %592 = vst [vmem:[%s556_s29] sm:$0xff] %v591_v13 }
 0x1be   : > { %v593_v5 = vld [vmem:[%s265_s24 + $0x8] sm:$0xff] }
 0x1bf   : > { %v595_v6 = vld [vmem:[%s265_s24 + $0x10] sm:$0xff]  ;;  %594 = vst [vmem:[%s556_s29 + $0x20] sm:$0xff] %v593_v5 }
 0x1c0   : > { %v597_v7 = vld [vmem:[%s265_s24 + $0x18] sm:$0xff]  ;;  %596 = vst [vmem:[%s556_s29 + $0x40] sm:$0xff] %v595_v6 }
 0x1c1   : > { %598 = vst [vmem:[%s556_s29 + $0x60] sm:$0xff] %v597_v7 }
 0x1c2 PF: > { %p12_p10 = scmp.ge.s32.totalorder %s785_s22, 6   ;;  %s913_s18 = smov %s730_s19 }
 0x1c3   : > { %s914_s19 = smov %s796_s25  ;;  %s915_s20 = smov %s785_s22 }
 0x1c4   :  { %14 = sbr.rel (!%p12_p10) target bundleno = 2 (0x2), region = 154 }

</bundles_post_ra>
